<compile_context>
chip_gen: v7x
topology: tpu7x:2x2x1
jax: 0.10.0
libtpu: 0.0.40
codegen_flags: <defaults>
</compile_context>

<pallas_src>
import jax
import jax.numpy as jnp
from jax.experimental import pallas as pl
from jax.experimental.pallas import tpu as pltpu


def _copy_kernel(x_ref, o_ref):
    # Lane/sublane-dense tile copy: full-vreg vld/vst, no masking.
    o_ref[...] = x_ref[...]


def _pick_lanes(total):
    # Largest lane width (multiple of 128) that divides the element count.
    for lanes in (4096, 2048, 1024, 512, 256, 128):
        if total % lanes == 0:
            return lanes
    return None


def flatten(x, *, use_kernel=True, max_tile_bytes=4 * 1024 * 1024):
    """Pallas equivalent of torch's `x.view(x.size(0), -1)`."""
    B = x.shape[0]
    N = 1
    for d in x.shape[1:]:
        N *= d
    total = B * N

    # Preferred path: flatten is a free metadata reshape on contiguous data.
    if not use_kernel:
        return x.reshape(B, N)

    lanes = _pick_lanes(total)
    if lanes is None:
        # Not 128-lane tileable: a copy kernel would only add masked edge
        # tiles and HBM traffic; the free reshape is strictly better.
        return x.reshape(B, N)

    rows = total // lanes
    dtype_bytes = jnp.dtype(x.dtype).itemsize
    row_bytes = lanes * dtype_bytes

    if rows <= 8:
        # Single block equal to the full array dims (allowed by Mosaic).
        tile_rows = rows
        grid_rows = 1
    else:
        # Multi-MiB, sublane-dense tile (row count a multiple of 8), capped so
        # in+out double-buffering (2 inputs-worth x 2 bufs) stays far below the
        # scoped VMEM limit on every generation (v5e/v6e/v7x).
        tile_rows = max(8, min(rows, (max_tile_bytes // row_bytes) // 8 * 8))
        grid_rows = pl.cdiv(rows, tile_rows)

    # Zero-cost reshape of the contiguous data into a lane/sublane-dense slab.
    x_slab = x.reshape(rows, lanes)

    out_slab = pl.pallas_call(
        _copy_kernel,
        out_shape=jax.ShapeDtypeStruct((rows, lanes), x.dtype),
        grid=(grid_rows,),
        in_specs=[pl.BlockSpec((tile_rows, lanes), lambda i: (i, 0))],
        out_specs=pl.BlockSpec((tile_rows, lanes), lambda i: (i, 0)),
        compiler_params=pltpu.CompilerParams(
            dimension_semantics=("parallel",),
            vmem_limit_bytes=32 * 1024 * 1024,
        ),
    )(x_slab)

    # Zero-cost reshape back to (B, N).
    return out_slab.reshape(B, N)


if __name__ == "__main__":
    key = jax.random.PRNGKey(0)

    # Small NCHW input consistent with the module's usage on conv features.
    x = jax.random.normal(key, (2, 4, 16, 16), dtype=jnp.float32)
    y = flatten(x)
    jax.block_until_ready(y)

    ref = x.reshape(x.shape[0], -1)   # torch's x.view(x.size(0), -1)
    assert y.shape == (2, 4 * 16 * 16), y.shape
    assert y.dtype == x.dtype
    assert jnp.array_equal(y, ref)

    # Exercise the pure-reshape fallback (feature size not a multiple of 128).
    x2 = jax.random.normal(key, (2, 3, 5, 7), dtype=jnp.float32)
    y2 = flatten(x2)
    jax.block_until_ready(y2)
    assert y2.shape == (2, 3 * 5 * 7)
    assert jnp.array_equal(y2, x2.reshape(2, -1))

    # Larger case: multiple grid steps with 8-row-aligned, lane-dense tiles.
    x3 = jax.random.normal(key, (4, 64, 32, 32), dtype=jnp.float32)
    y3 = flatten(x3)
    jax.block_until_ready(y3)
    assert y3.shape == (4, 64 * 32 * 32)
    assert jnp.array_equal(y3, x3.reshape(4, -1))

    print("KERNEL_OK")
</pallas_src>

<mosaic_0001>
module attributes {stable_mosaic.version = 11 : i64} {
  func.func @_copy_kernel(%arg0: i32, %arg1: memref<1x2048xf32, #tpu.memory_space<vmem>>, %arg2: memref<1x2048xf32, #tpu.memory_space<vmem>>) attributes {dimension_semantics = [#tpu.dimension_semantics<parallel>], iteration_bounds = array<i64: 1>, scalar_prefetch = 0 : i64, scratch_operands = 0 : i64, tpu.core_type = #tpu.core_type<tc>, window_params = [{transform_indices = @transform_0, window_bounds = array<i64: 1, 2048>}, {transform_indices = @transform_1, window_bounds = array<i64: 1, 2048>}]} {
    %c0 = arith.constant 0 : index
    %c0_0 = arith.constant 0 : index
    %0 = vector.load %arg1[%c0, %c0_0] : memref<1x2048xf32, #tpu.memory_space<vmem>>, vector<1x2048xf32>
    %c0_1 = arith.constant 0 : index
    %c0_2 = arith.constant 0 : index
    %1 = vector.load %arg2[%c0_1, %c0_2] : memref<1x2048xf32, #tpu.memory_space<vmem>>, vector<1x2048xf32>
    tpu.vector_store %arg2[%c0_1, %c0_2], %0 {strides = array<i32>} : memref<1x2048xf32, #tpu.memory_space<vmem>>, vector<1x2048xf32>,
    return
  }
  func.func @transform_0(%arg0: i32) -> (i32, i32) {
    %c0_i32 = arith.constant 0 : i32
    %c0_i32_0 = arith.constant 0 : i32
    return %arg0, %c0_i32 : i32, i32
  }
  func.func @transform_1(%arg0: i32) -> (i32, i32) {
    %c0_i32 = arith.constant 0 : i32
    %c0_i32_0 = arith.constant 0 : i32
    return %arg0, %c0_i32 : i32, i32
  }
}

</mosaic_0001>

<bundles_post_ra>
// kernel: tpu_custom_call.1
= control target key start
LH: loop header
LB: loop body
LE: loop exit
PB: predicated region body
PF: predicated region fallthrough
CT: control target
= control target key end

     0   :  { %6 = vsyncpa [#allocation3], 0  ;;  %s126_s0 = inlined_call_operand.hbm [shape: f32[1,2048], index: 0, kind: input, shape index: {}]   ;;  %s127_s1 = inlined_call_operand.hbm [shape: f32[1,2048], index: 1, kind: output, shape index: {}]  }
   0x1   :  { %7 = vsyncpa [#allocation4], 0  ;;  %s90_s6 = smov [#allocation2]   ;;  %s42_s10 = scalar_lea.hbm %s126_s0, 256 }
   0x2   :  { %s14_s7 = sshll.u32 %s90_s6, 4  ;;  %p43_p0 = scmp.ne.s32.totalorder %s126_s0, %s42_s10  ;;  %s15_s7 = int_to_ptr.vmem [resolvable:$true] %s14_s7 }
   0x3   :  { %p46_p1 = scmp.lt.u32.totalorder %s42_s10, %s126_s0 }
   0x5   :  { %p48_p2 = pnand %p46_p1, %p43_p0 }
   0x7   :  { %51 = shalt.err (!%p48_p2)
}
   0x8   :  { %s52_s15 = scalar_lea.vmem %s15_s7, 256  ;;  %p57_p4 = scmp.lt.s32.totalorder %s15_s7, %s15_s7 }
   0x9   :  { %p53_p3 = scmp.ne.s32.totalorder %s15_s7, %s52_s15  ;;  %p58_p5 = scmp.lt.s32.totalorder %s52_s15, %s52_s15 }
   0xb   :  { %p59_p6 = por %p58_p5, %p57_p4 }
   0xd   :  { %p60_p7 = pnand %p59_p6, %p53_p3 }
   0xf   :  { %63 = shalt.err (!%p60_p7)
}
  0x10   :  { %17 = dma.hbm_to_vmem [thread:$0]  %s126_s0, 256, %s15_s7, [#allocation3]  }
  0x11   :  { %86 = dma.done.wait [#allocation3], 256  }
  0x12   :  { %87 = vsyncadd [#allocation3], 4294967040  ;;  %s91_s18 = smov [#allocation5]   ;;  %v21_v0 = vld [vmem:[#allocation2] sm:$0xff]  ;;  %v22_v1 = vld [vmem:[#allocation2 + $0x8] sm:$0xff] }
  0x13   :  { %s31_s19 = sshll.u32 %s91_s18, 4  ;;  %23 = vst [vmem:[#allocation5] sm:$0xff] %v21_v0  ;;  %24 = vst [vmem:[#allocation5 + $0x8] sm:$0xff] %v22_v1  ;;  %s32_s19 = int_to_ptr.vmem [resolvable:$true] %s31_s19 }
  0x14   :  { %s64_s20 = scalar_lea.vmem %s32_s19, 256  ;;  %p69_p9 = scmp.lt.s32.totalorder %s32_s19, %s32_s19 }
  0x15   :  { %p65_p8 = scmp.ne.s32.totalorder %s32_s19, %s64_s20  ;;  %p70_p10 = scmp.lt.s32.totalorder %s64_s20, %s64_s20 }
  0x17   :  { %p71_p11 = por %p70_p10, %p69_p9 }
  0x19   :  { %p72_p12 = pnand %p71_p11, %p65_p8 }
  0x1b   :  { %75 = shalt.err (!%p72_p12)
}
  0x1c   :  { %s76_s0 = scalar_lea.hbm %s127_s1, 256 }
  0x1d   :  { %p77_p13 = scmp.ne.s32.totalorder %s127_s1, %s76_s0  ;;  %p80_p0 = scmp.lt.u32.totalorder %s76_s0, %s127_s1 }
  0x1f   :  { %p82_p1 = pnand %p80_p0, %p77_p13 }
  0x21   :  { %85 = shalt.err (!%p82_p1)
}
  0x22   :  { %34 = dma.vmem_to_hbm [thread:$0]  %s32_s19, 256, %s127_s1, [#allocation4]  }
  0x23   :  { %88 = dma.done.wait [#allocation4], 256  }
  0x24   :  { %89 = vsyncadd [#allocation4], 4294967040 }
  0x25   :  { %38 = vsyncpa [#allocation3], 1 }
  0x26   :  { %39 = vsyncpa [#allocation4], 1 }

</bundles_post_ra>
